<compile_context>
chip_gen: v7x
topology: tpu7x:2x2x1
jax: 0.10.0
libtpu: 0.0.40
codegen_flags: <defaults>
</compile_context>

<pallas_src>
import math
import functools

import jax
import jax.numpy as jnp
from jax import lax
from jax.experimental import pallas as pl
from jax.experimental.pallas import tpu as pltpu


def _ceil_to(x, m):
    return ((x + m - 1) // m) * m


def _pick_tile(dim_padded, max_tile):
    """Largest multiple of 128 that divides dim_padded and is <= max_tile."""
    t = max(128, (min(max_tile, dim_padded) // 128) * 128)
    while dim_padded % t != 0:
        t -= 128
    return t


def _sdpa_kernel(q_ref, kt_ref, v_ref, o_ref, m_scr, acc_scr, *,
                 sm_scale, d_out, block_n, n_valid):
    # q_ref : (1, E,     TM)   query tile (channels-first)
    # kt_ref: (1, TN,    E )   key tile, pre-transposed in the wrapper
    # v_ref : (1, D + 1, TN)   value tile with an appended ones row (denominator)
    # o_ref : (1, D,     TM)   output tile, resident across the N grid axis
    # m_scr : (1, TM) f32      running max over processed keys
    # acc_scr: (D + 1, TM) f32 fused [numerator ; denominator] accumulator
    ni = pl.program_id(2)

    @pl.when(ni == 0)
    def _init():
        m_scr[...] = jnp.full_like(m_scr, -jnp.inf)
        acc_scr[...] = jnp.zeros_like(acc_scr)

    q = q_ref[0]      # (E, TM)
    kt = kt_ref[0]    # (TN, E)
    v = v_ref[0]      # (D + 1, TN)

    # logits[n, m] = sum_e key[e, n] * query[e, m] / sqrt(E)   -- standard MXU matmul
    s = jnp.dot(kt, q, preferred_element_type=jnp.float32) * sm_scale  # (TN, TM)

    if n_valid is not None:
        n_idx = ni * block_n + lax.broadcasted_iota(jnp.int32, s.shape, 0)
        s = jnp.where(n_idx < n_valid, s, -1e30)

    # Online softmax over the N axis.
    m_prev = m_scr[...]                                # (1, TM)
    m_cur = jnp.max(s, axis=0, keepdims=True)          # (1, TM)
    m_new = jnp.maximum(m_prev, m_cur)
    alpha = jnp.exp(m_prev - m_new)                    # (1, TM)
    p = jnp.exp(s - m_new)                             # (TN, TM)

    # Rows 0..D-1 accumulate value @ p; row D accumulates sum_n p (denominator).
    acc_scr[...] = alpha * acc_scr[...] + jnp.dot(
        v, p.astype(v.dtype), preferred_element_type=jnp.float32)
    m_scr[...] = m_new

    @pl.when(ni == pl.num_programs(2) - 1)
    def _finalize():
        acc = acc_scr[...]
        num = acc[:d_out, :]               # (D, TM)
        den = acc[d_out:d_out + 1, :]      # (1, TM)
        o_ref[0] = (num * pl.reciprocal(den, approx=False)).astype(o_ref.dtype)


def scaled_dot_product_attention(query, key=None, value=None, mask=None, *,
                                 block_m=512, block_n=512):
    """Pallas TPU implementation of ScaledDotProductAttention.forward.

    query: (B, E, M), key: (B, E, N), value: (B, D, N)  ->  output: (B, D, M)
    """
    key = query if key is None else key
    value = key if value is None else value
    if mask is not None:
        # TODO(synk): user-provided mask (attn.masked_fill_(mask[None], -inf)) is not implemented.
        raise NotImplementedError("mask is not supported by this Pallas kernel")

    B, E, M = query.shape
    Bk, Ek, N = key.shape
    Bv, D, Nv = value.shape
    assert (B, E) == (Bk, Ek) and (B, N) == (Bv, Nv)

    sm_scale = 1.0 / math.sqrt(E)

    # Lane-dense tiling: pad M / N to multiples of 128, pick 128-aligned tiles.
    M_pad = _ceil_to(M, 128)
    N_pad = _ceil_to(N, 128)
    TM = _pick_tile(M_pad, block_m)
    TN = _pick_tile(N_pad, block_n)

    q = query
    if M_pad != M:
        q = jnp.pad(q, ((0, 0), (0, 0), (0, M_pad - M)))
    k = key
    v = value
    if N_pad != N:
        k = jnp.pad(k, ((0, 0), (0, 0), (0, N_pad - N)))
        v = jnp.pad(v, ((0, 0), (0, 0), (0, N_pad - N)))

    # One-time XLA layout fixes (keeps every in-kernel dot in (m,k)x(k,n) form).
    k_t = jnp.transpose(k, (0, 2, 1))                                   # (B, N_pad, E)
    v_aug = jnp.concatenate([v, jnp.ones((B, 1, N_pad), v.dtype)], 1)   # (B, D+1, N_pad)

    kernel = functools.partial(
        _sdpa_kernel,
        sm_scale=sm_scale,
        d_out=D,
        block_n=TN,
        n_valid=(N if N_pad != N else None),
    )

    out = pl.pallas_call(
        kernel,
        out_shape=jax.ShapeDtypeStruct((B, D, M_pad), query.dtype),
        grid_spec=pltpu.PrefetchScalarGridSpec(
            num_scalar_prefetch=0,
            grid=(B, M_pad // TM, N_pad // TN),
            in_specs=[
                pl.BlockSpec((1, E, TM), lambda b, mi, ni: (b, 0, mi)),      # query
                pl.BlockSpec((1, TN, E), lambda b, mi, ni: (b, ni, 0)),      # key^T
                pl.BlockSpec((1, D + 1, TN), lambda b, mi, ni: (b, 0, ni)),  # value + ones row
            ],
            out_specs=pl.BlockSpec((1, D, TM), lambda b, mi, ni: (b, 0, mi)),
            scratch_shapes=[
                pltpu.VMEM((1, TM), jnp.float32),       # running max
                pltpu.VMEM((D + 1, TM), jnp.float32),   # [numerator ; denominator]
            ],
        ),
        compiler_params=pltpu.CompilerParams(
            dimension_semantics=("parallel", "parallel", "arbitrary"),
            vmem_limit_bytes=48 * 1024 * 1024,  # above v5e/v6e default scoped limit, below v7x physical
        ),
    )(q, k_t, v_aug)

    if M_pad != M:
        out = out[:, :, :M]
    return out


def _reference(query, key=None, value=None, mask=None):
    """Pure-JAX reference mirroring the PyTorch forward exactly."""
    key = query if key is None else key
    value = key if value is None else value
    _, E, _ = query.shape
    q = query / math.sqrt(E)
    attn = jnp.einsum('ben,bem->bnm', key, q)          # key^T @ query
    if mask is not None:
        attn = jnp.where(mask[None], -jnp.inf, attn)
    attn = jax.nn.softmax(attn, axis=-2)               # softmax over N (dim=-2)
    return jnp.einsum('bdn,bnm->bdm', value, attn)     # value @ attn


if __name__ == "__main__":
    # Small deterministic example shapes (channels-first): B, E, M, N, D.
    B, E, M, N, D = 2, 16, 32, 24, 8

    root = jax.random.PRNGKey(0)
    kq, kk, kv = jax.random.split(root, 3)
    query = jax.random.normal(kq, (B, E, M), dtype=jnp.float32)
    key_t = jax.random.normal(kk, (B, E, N), dtype=jnp.float32)
    value = jax.random.normal(kv, (B, D, N), dtype=jnp.float32)

    # Cross-attention path.
    out = scaled_dot_product_attention(query, key_t, value)
    out = jax.block_until_ready(out)
    ref = _reference(query, key_t, value)
    assert out.shape == (B, D, M)
    assert jnp.allclose(out, ref, atol=5e-4, rtol=5e-4), (
        "cross-attn mismatch vs reference, max abs err = %g"
        % float(jnp.max(jnp.abs(out - ref))))

    # Self-attention default path (key=None, value=None -> key=value=query).
    out_self = scaled_dot_product_attention(query)
    out_self = jax.block_until_ready(out_self)
    ref_self = _reference(query)
    assert jnp.allclose(out_self, ref_self, atol=5e-4, rtol=5e-4), (
        "self-attn mismatch vs reference, max abs err = %g"
        % float(jnp.max(jnp.abs(out_self - ref_self))))

    print("KERNEL_OK")
</pallas_src>

<mosaic_0001>
module attributes {stable_mosaic.version = 11 : i64} {
  func.func @_sdpa_kernel(%arg0: i32, %arg1: i32, %arg2: i32, %arg3: memref<1x16x128xf32, #tpu.memory_space<vmem>>, %arg4: memref<1x128x16xf32, #tpu.memory_space<vmem>>, %arg5: memref<1x9x128xf32, #tpu.memory_space<vmem>>, %arg6: memref<1x8x128xf32, #tpu.memory_space<vmem>>, %arg7: memref<1x128xf32, #tpu.memory_space<vmem>>, %arg8: memref<9x128xf32, #tpu.memory_space<vmem>>) attributes {dimension_semantics = [#tpu.dimension_semantics<parallel>, #tpu.dimension_semantics<parallel>, #tpu.dimension_semantics<arbitrary>], iteration_bounds = array<i64: 2, 1, 1>, scalar_prefetch = 0 : i64, scratch_operands = 2 : i64, tpu.core_type = #tpu.core_type<tc>, window_params = [{transform_indices = @transform_0, window_bounds = array<i64: 1, 16, 128>}, {transform_indices = @transform_1, window_bounds = array<i64: 1, 128, 16>}, {transform_indices = @transform_2, window_bounds = array<i64: 1, 9, 128>}, {transform_indices = @transform_3, window_bounds = array<i64: 1, 8, 128>}]} {
    %c0_i32 = arith.constant 0 : i32
    %0 = arith.cmpi eq, %arg2, %c0_i32 : i32
    %1 = arith.extui %0 : i1 to i32
    %c0_i32_0 = arith.constant 0 : i32
    %2 = arith.cmpi ne, %1, %c0_i32_0 : i32
    scf.if %2 {
      %cst_23 = arith.constant 0xFF800000 : f32
      %39 = vector.broadcast %cst_23 : f32 to vector<1x128xf32>
      %c0_24 = arith.constant 0 : index
      %c0_25 = arith.constant 0 : index
      %40 = vector.load %arg7[%c0_24, %c0_25] : memref<1x128xf32, #tpu.memory_space<vmem>>, vector<1x128xf32>
      tpu.vector_store %arg7[%c0_24, %c0_25], %39 {strides = array<i32>} : memref<1x128xf32, #tpu.memory_space<vmem>>, vector<1x128xf32>,
      %cst_26 = arith.constant 0.000000e+00 : f32
      %41 = vector.broadcast %cst_26 : f32 to vector<9x128xf32>
      %c0_27 = arith.constant 0 : index
      %c0_28 = arith.constant 0 : index
      %42 = vector.load %arg8[%c0_27, %c0_28] : memref<9x128xf32, #tpu.memory_space<vmem>>, vector<9x128xf32>
      tpu.vector_store %arg8[%c0_27, %c0_28], %41 {strides = array<i32>} : memref<9x128xf32, #tpu.memory_space<vmem>>, vector<9x128xf32>,
    } else {
    }
    %c0 = arith.constant 0 : index
    %c0_1 = arith.constant 0 : index
    %c0_2 = arith.constant 0 : index
    %3 = vector.load %arg3[%c0, %c0_1, %c0_2] : memref<1x16x128xf32, #tpu.memory_space<vmem>>, vector<1x16x128xf32>
    %4 = vector.shape_cast %3 : vector<1x16x128xf32> to vector<16x128xf32>
    %c0_3 = arith.constant 0 : index
    %c0_4 = arith.constant 0 : index
    %c0_5 = arith.constant 0 : index
    %5 = vector.load %arg4[%c0_3, %c0_4, %c0_5] : memref<1x128x16xf32, #tpu.memory_space<vmem>>, vector<1x128x16xf32>
    %6 = vector.shape_cast %5 : vector<1x128x16xf32> to vector<128x16xf32>
    %c0_6 = arith.constant 0 : index
    %c0_7 = arith.constant 0 : index
    %c0_8 = arith.constant 0 : index
    %7 = vector.load %arg5[%c0_6, %c0_7, %c0_8] : memref<1x9x128xf32, #tpu.memory_space<vmem>>, vector<1x9x128xf32>
    %8 = vector.shape_cast %7 : vector<1x9x128xf32> to vector<9x128xf32>
    %cst = arith.constant dense<0.000000e+00> : vector<128x128xf32>
    %9 = tpu.matmul %6, %4, %cst {dimension_numbers = #tpu.dot_dimension_numbers<[1], [0], [0], [1], [0, 0, 1, 1], [], []>} : vector<128x16xf32>, vector<16x128xf32>, vector<128x128xf32> -> vector<128x128xf32>
    %cst_9 = arith.constant 2.500000e-01 : f32
    %10 = vector.broadcast %cst_9 : f32 to vector<128x128xf32>
    %11 = arith.mulf %9, %10 : vector<128x128xf32>
    %c128_i32 = arith.constant 128 : i32
    %12 = arith.muli %arg2, %c128_i32 : i32
    %13 = tpu.iota {dimensions = array<i32: 0>} : vector<128x128xi32>
    %14 = vector.broadcast %12 : i32 to vector<128x128xi32>
    %15 = arith.addi %14, %13 : vector<128x128xi32>
    %c24_i32 = arith.constant 24 : i32
    %16 = vector.broadcast %c24_i32 : i32 to vector<128x128xi32>
    %17 = arith.cmpi slt, %15, %16 : vector<128x128xi32>
    %cst_10 = arith.constant -1.000000e+30 : f32
    %18 = vector.broadcast %cst_10 : f32 to vector<128x128xf32>
    %19 = arith.select %17, %11, %18 : vector<128x128xi1>, vector<128x128xf32>
    %c0_11 = arith.constant 0 : index
    %c0_12 = arith.constant 0 : index
    %20 = vector.load %arg7[%c0_11, %c0_12] : memref<1x128xf32, #tpu.memory_space<vmem>>, vector<1x128xf32>
    %cst_13 = arith.constant dense<0xFF800000> : vector<128xf32>
    %21 = vector.multi_reduction <maximumf>, %19, %cst_13 [0] : vector<128x128xf32> to vector<128xf32>
    %22 = vector.shape_cast %21 : vector<128xf32> to vector<1x128xf32>
    %23 = arith.maximumf %20, %22 : vector<1x128xf32>
    %24 = arith.subf %20, %23 : vector<1x128xf32>
    %25 = math.exp %24 : vector<1x128xf32>
    %26 = vector.broadcast %23 : vector<1x128xf32> to vector<128x128xf32>
    %27 = arith.subf %19, %26 : vector<128x128xf32>
    %28 = math.exp %27 : vector<128x128xf32>
    %c0_14 = arith.constant 0 : index
    %c0_15 = arith.constant 0 : index
    %29 = vector.load %arg8[%c0_14, %c0_15] : memref<9x128xf32, #tpu.memory_space<vmem>>, vector<9x128xf32>
    %30 = vector.broadcast %25 : vector<1x128xf32> to vector<9x128xf32>
    %31 = arith.mulf %30, %29 : vector<9x128xf32>
    %cst_16 = arith.constant dense<0.000000e+00> : vector<9x128xf32>
    %32 = tpu.matmul %8, %28, %cst_16 {dimension_numbers = #tpu.dot_dimension_numbers<[1], [0], [0], [1], [0, 0, 1, 1], [], []>} : vector<9x128xf32>, vector<128x128xf32>, vector<9x128xf32> -> vector<9x128xf32>
    %33 = arith.addf %31, %32 : vector<9x128xf32>
    %c0_17 = arith.constant 0 : index
    %c0_18 = arith.constant 0 : index
    %34 = vector.load %arg8[%c0_17, %c0_18] : memref<9x128xf32, #tpu.memory_space<vmem>>, vector<9x128xf32>
    tpu.vector_store %arg8[%c0_17, %c0_18], %33 {strides = array<i32>} : memref<9x128xf32, #tpu.memory_space<vmem>>, vector<9x128xf32>,
    %c0_19 = arith.constant 0 : index
    %c0_20 = arith.constant 0 : index
    %35 = vector.load %arg7[%c0_19, %c0_20] : memref<1x128xf32, #tpu.memory_space<vmem>>, vector<1x128xf32>
    tpu.vector_store %arg7[%c0_19, %c0_20], %23 {strides = array<i32>} : memref<1x128xf32, #tpu.memory_space<vmem>>, vector<1x128xf32>,
    %c0_i32_21 = arith.constant 0 : i32
    %36 = arith.cmpi eq, %arg2, %c0_i32_21 : i32
    %37 = arith.extui %36 : i1 to i32
    %c0_i32_22 = arith.constant 0 : i32
    %38 = arith.cmpi ne, %37, %c0_i32_22 : i32
    scf.if %38 {
      %c0_23 = arith.constant 0 : index
      %c0_24 = arith.constant 0 : index
      %39 = vector.load %arg8[%c0_23, %c0_24] : memref<9x128xf32, #tpu.memory_space<vmem>>, vector<9x128xf32>
      %40 = vector.extract_strided_slice %39 {offsets = [0, 0], sizes = [8, 128], strides = [1, 1]} : vector<9x128xf32> to vector<8x128xf32>
      %41 = vector.extract_strided_slice %39 {offsets = [8, 0], sizes = [1, 128], strides = [1, 1]} : vector<9x128xf32> to vector<1x128xf32>
      %42 = tpu.reciprocal %41 : vector<1x128xf32> -> vector<1x128xf32>
      %43 = vector.broadcast %42 : vector<1x128xf32> to vector<8x128xf32>
      %44 = arith.mulf %40, %43 : vector<8x128xf32>
      %c0_25 = arith.constant 0 : index
      %c0_26 = arith.constant 0 : index
      %c0_27 = arith.constant 0 : index
      %45 = vector.load %arg6[%c0_25, %c0_26, %c0_27] : memref<1x8x128xf32, #tpu.memory_space<vmem>>, vector<1x8x128xf32>
      %46 = vector.shape_cast %45 : vector<1x8x128xf32> to vector<8x128xf32>
      %47 = vector.shape_cast %44 : vector<8x128xf32> to vector<1x8x128xf32>
      tpu.vector_store %arg6[%c0_25, %c0_26, %c0_27], %47 {strides = array<i32>} : memref<1x8x128xf32, #tpu.memory_space<vmem>>, vector<1x8x128xf32>,
    } else {
    }
    return
  }
  func.func @transform_0(%arg0: i32, %arg1: i32, %arg2: i32) -> (i32, i32, i32) {
    %c0_i32 = arith.constant 0 : i32
    %c0_i32_0 = arith.constant 0 : i32
    return %arg0, %c0_i32, %arg1 : i32, i32, i32
  }
  func.func @transform_1(%arg0: i32, %arg1: i32, %arg2: i32) -> (i32, i32, i32) {
    %c0_i32 = arith.constant 0 : i32
    %c0_i32_0 = arith.constant 0 : i32
    return %arg0, %arg2, %c0_i32 : i32, i32, i32
  }
  func.func @transform_2(%arg0: i32, %arg1: i32, %arg2: i32) -> (i32, i32, i32) {
    %c0_i32 = arith.constant 0 : i32
    %c0_i32_0 = arith.constant 0 : i32
    return %arg0, %c0_i32, %arg2 : i32, i32, i32
  }
  func.func @transform_3(%arg0: i32, %arg1: i32, %arg2: i32) -> (i32, i32, i32) {
    %c0_i32 = arith.constant 0 : i32
    %c0_i32_0 = arith.constant 0 : i32
    return %arg0, %c0_i32, %arg1 : i32, i32, i32
  }
}

</mosaic_0001>

<bundles_post_ra>
// kernel: tpu_custom_call.1
= control target key start
LH: loop header
LB: loop body
LE: loop exit
PB: predicated region body
PF: predicated region fallthrough
CT: control target
= control target key end

     0   :  { %8 = vsyncpa [#allocation5], 0  ;;  %s1385_s0 = inlined_call_operand.vmem [shape: f32[2,16,128], index: 0, kind: input, shape index: {}]   ;;  %s1386_s1 = inlined_call_operand.vmem [shape: f32[2,128,16], index: 1, kind: input, shape index: {}]   ;;  %s1387_s2 = inlined_call_operand.vmem [shape: f32[2,9,128], index: 2, kind: input, shape index: {}]   ;;  %s1388_s3 = inlined_call_operand.hbm [shape: f32[2,8,128], index: 3, kind: output, shape index: {}]  }
   0x1   :  { %10 = vsyncpa [#allocation5 + $0x1], 0  ;;  %s1224_s12 = smov 0   ;;  %s1226_s13 = smov 0  }
   0x2   :  { %s1228_s14 = smov 0   ;;  %s1230_s15 = smov 0  }
   0x3   :  { %s1232_s16 = smov 0   ;;  %s1234_s17 = smov 0  }
   0x4 LB: > { %s882_s18 = sadd.s32 4294967295, %s1199_s17   ;;  %s883_s19 = sadd.s32 4294967294, %s1199_s17   ;;  %s1199_s17 = sphi %s1234_s17, %s16_s17   ;;  %s1195_s16 = sphi %s1232_s16, %s1395_s16   ;;  %s1191_s15 = sphi %s1230_s15, %s1394_s15   ;;  %s1187_s14 = sphi %s1228_s14, %s1393_s14   ;;  %s1183_s13 = sphi %s1226_s13, %s1392_s13   ;;  %s1179_s12 = sphi %s1224_s12, %s1391_s12  }
   0x5   : > { %s35_s20 = sadd.s32 1, %s1195_s16  ;;  %s128_s21 = sadd.s32 1, %s1187_s14 }
   0x6   : > { %p37_p0 = scmp.ge.s32.totalorder %s35_s20, 2  ;;  %p138_p1 = scmp.ne.s32.totalorder %s1187_s14, %s1183_s13 }
   0x7   : > { %p139_p2 = scmp.eq.s32.totalorder %s882_s18, 1  ;;  %p144_p3 = scmp.ne.s32.totalorder %s1183_s13, %s1179_s12 }
   0x8   : > { %s1397_s20 = smov (%p37_p0, %s35_s20), 0  ;;  %p145_p5 = scmp.eq.s32.totalorder %s883_s19, 1 }
   0x9   : > { %p1264_p4 = por %p139_p2, %p138_p1  ;;  %s123_s23 = ssub.s32 %s1195_s16, %s1397_s20 }
   0xa   : > { %p886_p6 = scmp.ge.s32.totalorder %s1199_s17, 1  ;;  %p126_p7 = scmp.eq.s32.totalorder %s123_s23, 0 }
   0xb   : > { %p1271_p8 = por %p145_p5, %p144_p3  ;;  %p198_p9 = scmp.lt.s32.totalorder %s1199_s17, 3 }
   0xc   : > { %s1277_s25 = scalar_select %p126_p7, %s1187_s14, %s128_s21  }
   0xd   : > { %p199_p10 = pnand %p886_p6, %p198_p9 }
   0xe   : > { %p242_p11 = scmp.lt.s32.totalorder (!%p199_p10), %s1191_s15, 1  ;;  %vm295_vm0 = vcmask (!%p199_p10), 130048   ;;  %v1201_v7 = vmov (!%p199_p10), -inf   ;;  %v1202_v8 = vmov (!%p199_p10), 0.0   ;;  %v599_v43 = vlaneseq (!%p199_p10)  ;;  %s239_s11 = sand.u32 (!%p199_p10), 1, %s1183_s13  }
   0xf   : > { %202 = sbr.rel (%p199_p10) target bundleno = 580 (0x244), region = 32  ;;  %272 = vst [vmem:[#allocation2] sm:$0x1] (!%p199_p10), %v1201_v7  ;;  %274 = vst [vmem:[#allocation3 + $0x8] sm:$0x1] (!%p199_p10), %v1202_v8  ;;  %s887_s18 = sshll.u32 (!%p199_p10), %s239_s11, 3 }
  0x10   : > { %v600_v46 = vshrl.u32 (!%p199_p10), %v599_v43, 7  ;;  %s911_s19 = sshll.u32 (!%p199_p10), %s1191_s15, 7  ;;  %s241_s21 = scalar_lea.vmem (!%p199_p10), [#allocation4], %s887_s18 }
  0x11   : > { %s769_s23 = sshll.u32 (!%p199_p10), %s241_s21, 4  ;;  %s755_s29 = scalar_lea.sflag (!%p199_p10), [#allocation5], %s239_s11  ;;  %s1340_s23 = int_to_ptr.vmem [resolvable:$true] %s769_s23 }
  0x12   : > { %v1327_v50 = vsub.s32 (!%p199_p10), 0, %v600_v46  ;;  %s1121_s30 = scalar_lea.vmem (!%p199_p10), %s1340_s23, 128 }
  0x13   : > { %p1122_p12 = scmp.ne.s32.totalorder (!%p199_p10), %s1340_s23, %s1121_s30 }
  0x15   : > { %p1123_p13 = pnand (!%p199_p10), %p1122_p12, %p1264_p4 }
  0x16   : > { %s243_s26 = scalar_select %p242_p11, %s1191_s15, 1  ;;  %v572_v48 = vld [vmem:[#allocation2] sm:$0x1] }
  0x17   : > { %p1124_p0 = pneg %p1123_p13  ;;  %s1203_s15 = smov [#allocation4]  }
  0x18   : > { %s914_s27 = sshll.u32 %s243_s26, 4  ;;  %s915_s28 = sshll.u32 %s243_s26, 7 }
  0x19   : > { %s249_s4 = scalar_lea.vmem %s1385_s0, %s914_s27  ;;  %s1287_s7 = scalar_lea.vmem %s1386_s1, %s915_s28 }
  0x1a   : > { %v275_v0 = vld [vmem:[%s249_s4] sm:$0xff]  ;;  %v276_v1 = vld [vmem:[%s249_s4 + $0x8] sm:$0xff]  ;;  %v279_v5 = vld [vmem:[%s1287_s7 + $0x10] sm:$0xff]  ;;  %s1300_s10 = scalar_lea.vmem %s1387_s2, %s914_s27  ;;  %s1338_s28 = scalar_lea.hbm %s1388_s3, %s911_s19 }
  0x1b   : > { %v277_v2 = vld [vmem:[%s1287_s7] sm:$0xff]  ;;  %v1016_v3 = vpack.c.bf16 %v276_v1, %v275_v0  ;;  %v278_v4 = vld [vmem:[%s1287_s7 + $0x8] sm:$0xff]  ;;  %v280_v6 = vld [vmem:[%s1287_s7 + $0x18] sm:$0xff]  ;;  %s1125_s4 = sshll.u32 %s1203_s15, 4  ;;  %s1126_s4 = int_to_ptr.vmem [resolvable:$false] %s1125_s4 }
  0x1c   : > { %957 = vmatprep.mubr.msk.f32.mxu0 %vm295_vm0, %v277_v2  ;;  %v293_v9 = vld [vmem:[%s1300_s10] sm:$0xff]  ;;  %v282_v11 = vld [vmem:[%s1287_s7 + $0x28] sm:$0xff]  ;;  %v283_v12 = vld [vmem:[%s1287_s7 + $0x30] sm:$0xff]  ;;  %s1127_s5 = scalar_lea.vmem %s1126_s4, 256  ;;  %p1128_p1 = scmp.lt.s32.totalorder %s1340_s23, %s1126_s4 }
  0x1d   : > { %1017 = vmatprep.subr.bf16.mxu0 %v1016_v3  ;;  %1013 = vmatprep.mubr.f32.mxu1 %v293_v9  ;;  %v281_v10 = vld [vmem:[%s1287_s7 + $0x20] sm:$0xff]  ;;  %v284_v13 = vld [vmem:[%s1287_s7 + $0x38] sm:$0xff]  ;;  %v286_v15 = vld [vmem:[%s1287_s7 + $0x48] sm:$0xff]  ;;  %p1129_p2 = scmp.lt.s32.totalorder %s1127_s5, %s1121_s30 }
  0x1e   : > { %1019 = vmatpush3.bf16.msra.mxu0 %v1016_v3  ;;  %v285_v14 = vld [vmem:[%s1287_s7 + $0x40] sm:$0xff]  ;;  %v287_v16 = vld [vmem:[%s1287_s7 + $0x50] sm:$0xff]  ;;  %v288_v17 = vld [vmem:[%s1287_s7 + $0x58] sm:$0xff] }
  0x1f   : > { %v289_v18 = vld [vmem:[%s1287_s7 + $0x60] sm:$0xff]  ;;  %v290_v19 = vld [vmem:[%s1287_s7 + $0x68] sm:$0xff]  ;;  %v291_v20 = vld [vmem:[%s1287_s7 + $0x70] sm:$0xff]  ;;  %p1130_p3 = por %p1129_p2, %p1128_p1 }
  0x20   : > { %v292_v21 = vld [vmem:[%s1287_s7 + $0x78] sm:$0xff] }
  0x21   : > { %958 = vmatmul.mubr.msk.f32.vlgmr.msra.gmra.mrb[0].mxu0 %vm295_vm0, %v278_v4  ;;  %p1131_p5 = pnand %p1130_p3, %p1124_p0 }
  0x22   : > { %960 = vmatprep.mubr.msk.f32.mxu0 %vm295_vm0, %v279_v5  ;;  %v294_v5 = vld [vmem:[%s1300_s10 + $0x8] sm:$0x1] }
  0x25   : > { %961 = vmatmul.mubr.msk.f32.gmra.mrb[2].mxu0 %vm295_vm0, %v280_v6 }
  0x26   : > { %963 = vmatprep.mubr.msk.f32.mxu0 %vm295_vm0, %v281_v10 }
  0x29   : > { %964 = vmatmul.mubr.msk.f32.gmra.mrb[4].mxu0 %vm295_vm0, %v282_v11 }
  0x2a   : > { %966 = vmatprep.mubr.msk.f32.mxu0 %vm295_vm0, %v283_v12 }
  0x2d   : > { %967 = vmatmul.mubr.msk.f32.gmra.mrb[6].mxu0 %vm295_vm0, %v284_v13 }
  0x2e   : > { %969 = vmatprep.mubr.msk.f32.mxu0 %vm295_vm0, %v285_v14 }
  0x31   : > { %970 = vmatmul.mubr.msk.f32.gmra.mrb[8].mxu0 %vm295_vm0, %v286_v15 }
  0x32   : > { %972 = vmatprep.mubr.msk.f32.mxu0 %vm295_vm0, %v287_v16 }
  0x35   : > { %973 = vmatmul.mubr.msk.f32.gmra.mrb[10].mxu0 %vm295_vm0, %v288_v17 }
  0x36   : > { %975 = vmatprep.mubr.msk.f32.mxu0 %vm295_vm0, %v289_v18 }
  0x39   : > { %976 = vmatmul.mubr.msk.f32.gmra.mrb[12].mxu0 %vm295_vm0, %v290_v19 }
  0x3a   : > { %978 = vmatprep.mubr.msk.f32.mxu0 %vm295_vm0, %v291_v20 }
  0x3d   : > { %979 = vmatmul.mubr.msk.f32.gmra.mrb[14].mxu0 %vm295_vm0, %v292_v21  ;;  %v653_v21 = vld [vmem:[#allocation3 + $0x8] sm:$0x1] }
  0xf4   : > { %v959_v22 = vpop.f32.mrb[0].mxu0 }
  0xf5   : > { %v490_v23 = vmul.f32 0.25, %v959_v22  ;;  %v410_v24 = vpop.f32.mrb[1].mxu0 }
  0xf6   : > { %v489_v25 = vmul.f32 0.25, %v410_v24 }
  0xf7   : > { %v574_v26 = vmax.f32 %v490_v23, -1e+30 }
  0xf8   : > { %v573_v27 = vmax.f32 %v489_v25, -1e+30  ;;  %v962_v28 = vpop.f32.mrb[2].mxu0 }
  0xf9   : > { %v578_v29 = vmax.f32 %v574_v26, -1e+30  ;;  %v420_v30 = vpop.f32.mrb[3].mxu0 }
  0xfa   : > { %v577_v31 = vmax.f32 %v573_v27, -1e+30  ;;  %v491_v32 = vmul.f32 0.25, %v420_v30 }
  0xfb   : > { %v582_v33 = vmax.f32 %v578_v29, -1e+30 }
  0xfc   : > { %v581_v34 = vmax.f32 %v577_v31, -1e+30  ;;  %v575_v35 = vmax.f32 %v491_v32, -1e+30  ;;  %v965_v6 = vpop.f32.mrb[4].mxu0 }
  0xfd   : > { %v430_v7 = vpop.f32.mrb[5].mxu0 }
  0xfe   : > { %v585_v36 = vmax.f32 %v581_v34, %v582_v33  ;;  %v579_v37 = vmax.f32 %v575_v35, -1e+30 }
 0x100   : > { %v583_v38 = vmax.f32 %v579_v37, -1e+30  ;;  %v968_v8 = vpop.f32.mrb[6].mxu0 }
 0x101   : > { %v440_v9 = vpop.f32.mrb[7].mxu0 }
 0x102   : > { %v586_v39 = vmax.f32 %v583_v38, -1e+30 }
 0x104   : > { %v587_v40 = vmax.f32 %v585_v36, %v586_v39  ;;  %v971_v10 = vpop.f32.mrb[8].mxu0 }
 0x105   : > { %v450_v11 = vpop.f32.mrb[9].mxu0 }
 0x106   : > { %v588_v41 = vrot.slane %v587_v40, 4 }
 0x108   : > { %v589_v42 = vmax.f32 %v587_v40, %v588_v41  ;;  %v974_v12 = vpop.f32.mrb[10].mxu0 }
 0x109   : > { %v460_v13 = vpop.f32.mrb[11].mxu0 }
 0x10a   : > { %v590_v44 = vrot.slane %v589_v42, 2 }
 0x10c   : > { %v591_v45 = vmax.f32 %v589_v42, %v590_v44  ;;  %v977_v14 = vpop.f32.mrb[12].mxu0 }
 0x10d   : > { %v470_v15 = vpop.f32.mrb[13].mxu0 }
 0x10e   : > { %v592_v47 = vrot.slane %v591_v45, 1 }
 0x110   : > { %v593_v49 = vmax.f32 %v591_v45, %v592_v47  ;;  %v980_v16 = vpop.f32.mrb[14].mxu0 }
 0x111   : > { %v480_v17 = vpop.f32.mrb[15].mxu0 }
 0x112   : > { %v594_v51 = vmax.f32 %v572_v48, %v593_v49 }
 0x114   : > { %v602_v52 = vrot.slane %v594_v51, %v1327_v50  ;;  %741 = vst [vmem:[#allocation2] sm:$0x1] %v594_v51  ;;  %v595_v53 = vsub.f32 %v572_v48, %v594_v51 }
 0x116   : > { %v606_v54 = vsub.f32 %v491_v32, %v602_v52  ;;  %v604_v55 = vsub.f32 %v489_v25, %v602_v52  ;;  %v605_v56 = vsub.f32 %v490_v23, %v602_v52  ;;  %v607_v57 = vsub.f32 -1e+30, %v602_v52 }
 0x117   : > { %v596_v18 = vmul.f32 1.442695, %v595_v53 }
 0x118   : > { %v624_v58 = vmul.f32 1.442695, %v606_v54  ;;  %v620_v59 = vmul.f32 1.442695, %v604_v55  ;;  %v622_v60 = vmul.f32 1.442695, %v605_v56 }
 0x119   : > { %v626_v61 = vmul.f32 1.442695, %v607_v57 }
 0x11a   : > { %1109 = vpow2.f32 %v624_v58 }
 0x11b   : > { %1111 = vpow2.f32 %v620_v59 }
 0x11c   : > { %1113 = vpow2.f32 %v622_v60 }
 0x11d   : > { %1115 = vpow2.f32 %v626_v61 }
 0x11e   : > { %1117 = vpow2.f32 %v596_v18 }
 0x124   : > { %v1110_v62 = vpop.eup %1109 }
 0x125   : > { %v1112_v63 = vpop.eup %1111 }
 0x126   : > { %v1114_v0 = vpop.eup %1113 }
 0x127   : > { %v1116_v1 = vpop.eup %1115  ;;  %v1020_v2 = vpack.c.bf16 %v1114_v0, %v1112_v63 }
 0x128   : > { %v1024_v3 = vpack.c.bf16 %v1116_v1, %v1110_v62  ;;  %v1028_v4 = vpack.c.bf16 %v1116_v1, %v1116_v1  ;;  %v1118_v19 = vpop.eup %1117 }
 0x129   : > { %1021 = vmatprep.subr.bf16.mxu1 %v1020_v2  ;;  %v658_v20 = vrot.slane %v1118_v19, %v1327_v50 }
 0x12a   : > { %1023 = vmatpush3.bf16.msra.mxu1 %v1020_v2 }
 0x12b   : > { %1025 = vmatprep.subr.bf16.mxu1 %v1024_v3  ;;  %v661_v22 = vmul.f32 %v658_v20, %v653_v21  ;;  %v660_v24 = vmul.f32 0.0, %v658_v20 }
 0x12e   : > { %1027 = vmatpush3.bf16.msra.mxu1 %v1024_v3 }
 0x12f   : > { %1029 = vmatprep.subr.bf16.mxu1 %v1028_v4 }
 0x132   : > { %1031 = vmatpush3.bf16.msra.mxu1 %v1028_v4 }
 0x133   : > { %1033 = vmatprep.subr.bf16.mxu1 %v1028_v4 }
 0x136   : > { %1035 = vmatpush3.bf16.msra.mxu1 %v1028_v4 }
 0x137   : > { %1037 = vmatprep.subr.bf16.mxu1 %v1028_v4 }
 0x13a   : > { %1039 = vmatpush3.bf16.msra.mxu1 %v1028_v4 }
 0x13b   : > { %1041 = vmatprep.subr.bf16.mxu1 %v1028_v4 }
 0x13e   : > { %1043 = vmatpush3.bf16.msra.mxu1 %v1028_v4 }
 0x13f   : > { %1045 = vmatprep.subr.bf16.mxu1 %v1028_v4 }
 0x142   : > { %1047 = vmatpush3.bf16.msra.mxu1 %v1028_v4 }
 0x143   : > { %1049 = vmatprep.subr.bf16.mxu1 %v1028_v4 }
 0x146   : > { %1051 = vmatpush3.bf16.msra.mxu1 %v1028_v4 }
 0x149   : > { %1014 = vmatmul.mubr.f32.vlgmr.msra.gmra.mrb[0].mxu1 %v294_v5 }
 0x21c   : > { %v1015_v23 = vpop.f32.mrb[0].mxu1 }
 0x21d   : > { %v738_v25 = vadd.f32 %v1015_v23, %v661_v22  ;;  %v728_v26 = vpop.f32.mrb[1].mxu1 }
 0x21e   : > { %v737_v27 = vadd.f32 %v728_v26, %v660_v24 }
 0x21f   : > { %740 = vst [vmem:[#allocation3 + $0x8] sm:$0x1] %v738_v25 }
 0x226   : > { %v746_v28 = vld [vmem:[#allocation3 + $0x8] sm:$0x1] }
 0x227   : > { %1119 = vrcp.f32 %v746_v28 }
 0x231   : > { %v1120_v29 = vpop.eup %1119 }
 0x232   : > { %v751_v30 = vrot.slane %v1120_v29, %v1327_v50 }
 0x234   : > { %v752_v31 = vmul.f32 %v751_v30, %v737_v27 }
 0x236   : > { %753 = vst [vmem:[%s241_s21] sm:$0xff] %v752_v31 }
 0x237   : > { %1134 = shalt.err (!%p1131_p5)
}
 0x238   : > { %s1135_s6 = scalar_lea.hbm %s1338_s28, 128  ;;  %s1139_s9 = scalar_lea.hbm %s1388_s3, 256 }
 0x239   : > { %p1136_p6 = scmp.ne.s32.totalorder %s1338_s28, %s1135_s6  ;;  %p1140_p10 = scmp.lt.u32.totalorder %s1338_s28, %s1388_s3 }
 0x23a   : > { %p1141_p11 = scmp.lt.u32.totalorder %s1139_s9, %s1135_s6  ;;  %p1143_p13 = scmp.lt.u32.totalorder %s1135_s6, %s1338_s28 }
 0x23b   : > { %p1137_p7 = pnand %p1136_p6, %p1264_p4 }
 0x23c   : > { %p1142_p12 = por %p1141_p11, %p1140_p10 }
 0x23d   : > { %p1138_p9 = pneg %p1137_p7 }
 0x23e   : > { %p1144_p0 = por %p1143_p13, %p1142_p12 }
 0x240   : > { %p1145_p1 = pnand %p1144_p0, %p1138_p9 }
 0x242   : > { %1148 = shalt.err (!%p1145_p1)
}
 0x243   : > { %1052 = dma.vmem_to_hbm [thread:$0]  (%p1264_p4), %s1340_s23, 128, %s1338_s28, %s755_s29  }
 0x244 PF: > { %p1058_p2 = scmp.ge.s32.totalorder %s1199_s17, 2  ;;  %s781_s18 = sand.u32 1, %s1179_s12  }
 0x245   : > { %s782_s19 = scalar_lea.sflag [#allocation5], %s781_s18 }
 0x246   : > { %p1055_p3 = pnand %p1058_p2, %p1271_p8 }
 0x248   : > { %1174 = dma.done.wait (!%p1055_p3), %s782_s19, 128  }
 0x249   : > { %1176 = vsyncadd (!%p1055_p3), %s782_s19, 4294967168  ;;  %s16_s17 = sadd.s32 1, %s1199_s17   ;;  %s1391_s12 = smov %s1183_s13 }
 0x24a   : > { %p13_p5 = scmp.ge.s32.totalorder %s16_s17, 4   ;;  %s1392_s13 = smov %s1187_s14 }
 0x24b   : > { %s1393_s14 = smov %s1277_s25  ;;  %s1394_s15 = smov %s1195_s16 }
 0x24c   : > { %s1395_s16 = smov %s1397_s20  ;;  %15 = sbr.rel (!%p13_p5) target bundleno = 4 (0x4), region = 81 }
 0x253   :  { %787 = vsyncpa [#allocation5], 1 }
 0x254   :  { %789 = vsyncpa [#allocation5 + $0x1], 1 }

</bundles_post_ra>
